<compile_context>
chip_gen: v6e
topology: v6e:2x2x1
jax: 0.10.0
libtpu: 0.0.40
codegen_flags: <defaults>
</compile_context>

<pallas_src>
import jax
import jax.numpy as jnp
from jax.experimental import pallas as pl
from jax.experimental.pallas import tpu as pltpu

INPUT_DIM = 10
NUM_EXPERTS = 4
HIDDEN_DIM = 64
TOP_K = 2


def moe_kernel(xT_ref, wgT_ref, bgT_ref, w1T_ref, b1T_ref, w2T_ref, b2T_ref,
               expT_ref, outT_ref, scoresT_ref):
    xT = xT_ref[...]                                          # (D, TB) f32

    # --- gating: (E, D) @ (D, TB) -> (E, TB); per-column stable softmax
    #     (reduction over E=4 sublanes -> cheap XLU op) ---
    logits = jnp.dot(wgT_ref[...], xT,
                     preferred_element_type=jnp.float32) + bgT_ref[...]
    m = jnp.max(logits, axis=0, keepdims=True)
    e = jnp.exp(logits - m)
    scores = e / jnp.sum(e, axis=0, keepdims=True)            # (E, TB)
    scoresT_ref[...] = scores                                 # lane-dense store

    # --- top-k gate mask along the expert (sublane) axis
    #     (first occurrence wins on ties, matching torch.topk) ---
    row = jax.lax.broadcasted_iota(jnp.int32, scores.shape, 0)
    s = scores
    weight = jnp.zeros_like(scores)
    for _ in range(TOP_K):                                    # static unroll, K=2
        mx = jnp.max(s, axis=0, keepdims=True)
        is_max = s >= mx
        first_row = jnp.min(jnp.where(is_max, row, NUM_EXPERTS),
                            axis=0, keepdims=True)
        sel = row == first_row
        weight = weight + jnp.where(sel, scores, 0.0)
        s = jnp.where(sel, -jnp.inf, s)

    # --- fused layer 1 (all experts at once): (E*H, D) @ (D, TB) -> (E*H, TB)
    h = jnp.dot(w1T_ref[...], xT,
                preferred_element_type=jnp.float32) + b1T_ref[...]
    h = jnp.maximum(h, 0.0)                                   # ReLU

    # --- fold gate weights into hidden acts without in-kernel reshapes:
    #     expand (E, TB) -> (E*H, TB) via constant block-ones matrix (tiny
    #     K=4 MXU op, lane-dense output) ---
    wexp = jnp.dot(expT_ref[...], weight,
                   preferred_element_type=jnp.float32)        # (E*H, TB)
    hflat = h * wexp

    # --- fused layer 2: (D, E*H) @ (E*H, TB); bias term = (D, E) @ (E, TB) ---
    y = jnp.dot(w2T_ref[...], hflat, preferred_element_type=jnp.float32)
    y = y + jnp.dot(b2T_ref[...], weight, preferred_element_type=jnp.float32)
    outT_ref[...] = y                                         # lane-dense store


def _select_tb(B, tb):
    """Pick the lane-axis batch tile.

    - multiple of 128 (lane width) whenever B > 128, never collapsed to a
      single huge full-batch block,
    - capped so the batch grid has >= 2 steps for medium/large B, letting the
      'parallel' axis split across v7x's two TensorCores.
    """
    if B <= 128:
        return B                       # a single full-dim block is legal
    tb = min(tb, B)
    half = (pl.cdiv(B, 2) // 128) * 128
    if half >= 128:
        tb = min(tb, half)             # guarantee >= 2 grid steps
    return max((tb // 128) * 128, 128)


def moe_forward(x, params, tb=2048):
    B, D = x.shape
    E, H = NUM_EXPERTS, HIDDEN_DIM
    wg, bg, w1, b1, w2, b2 = params

    # All layout work (transpose / reshape / concat) is done once in XLA,
    # outside the kernel, so the kernel only sees lane-dense tiles.
    xT = x.T                                                   # (D, B)
    wgT = wg.T                                                 # (E, D)
    bgT = bg.reshape(E, 1)                                     # (E, 1)
    w1T = jnp.transpose(w1, (0, 2, 1)).reshape(E * H, D)       # (E*H, D)
    b1T = b1.reshape(E * H, 1)                                 # (E*H, 1)
    w2T = jnp.transpose(w2, (2, 0, 1)).reshape(D, E * H)       # (D, E*H)
    b2T = b2.reshape(E, D).T                                   # (D, E)
    expT = jnp.kron(jnp.eye(E, dtype=jnp.float32),
                    jnp.ones((H, 1), jnp.float32))             # (E*H, E) block-ones

    tb = _select_tb(B, tb)
    grid = (pl.cdiv(B, tb),)

    def resident(shape):                                       # stays in VMEM
        return pl.BlockSpec(shape, lambda i: (0, 0))

    outT, scoresT = pl.pallas_call(
        moe_kernel,
        out_shape=(jax.ShapeDtypeStruct((D, B), jnp.float32),
                   jax.ShapeDtypeStruct((E, B), jnp.float32)),
        grid=grid,
        in_specs=[
            pl.BlockSpec((D, tb), lambda i: (0, i)),           # xT: lanes = batch
            resident((E, D)),                                  # gate W^T
            resident((E, 1)),                                  # gate b
            resident((E * H, D)),                              # fused W1^T
            resident((E * H, 1)),                              # fused b1
            resident((D, E * H)),                              # fused W2^T
            resident((D, E)),                                  # stacked b2^T
            resident((E * H, E)),                              # gate-expand matrix
        ],
        out_specs=(pl.BlockSpec((D, tb), lambda i: (0, i)),
                   pl.BlockSpec((E, tb), lambda i: (0, i))),
        compiler_params=pltpu.CompilerParams(
            dimension_semantics=("parallel",),
            vmem_limit_bytes=32 * 1024 * 1024),
    )(xT, wgT, bgT, w1T, b1T, w2T, b2T, expT)

    # Present outputs in the module's (B, D)/(B, E) layout; transpose is
    # one-time wrapper-side layout plumbing (XLA), not kernel work.
    return outT.T, scoresT.T


def init_params(key):
    # Deterministic init mimicking nn.Linear's U(-1/sqrt(fan_in), 1/sqrt(fan_in)).
    ks = jax.random.split(key, 6)

    def lin(k, fan_in, shape):
        bound = 1.0 / (fan_in ** 0.5)
        return jax.random.uniform(k, shape, jnp.float32, -bound, bound)

    wg = lin(ks[0], INPUT_DIM, (INPUT_DIM, NUM_EXPERTS))
    bg = lin(ks[1], INPUT_DIM, (1, NUM_EXPERTS))
    w1 = lin(ks[2], INPUT_DIM, (NUM_EXPERTS, INPUT_DIM, HIDDEN_DIM))
    b1 = lin(ks[3], INPUT_DIM, (NUM_EXPERTS, 1, HIDDEN_DIM))
    w2 = lin(ks[4], HIDDEN_DIM, (NUM_EXPERTS, HIDDEN_DIM, INPUT_DIM))
    b2 = lin(ks[5], HIDDEN_DIM, (NUM_EXPERTS, 1, INPUT_DIM))
    return wg, bg, w1, b1, w2, b2


def moe_reference(x, params):
    # Pure-JAX reference reproducing the PyTorch forward semantics.
    wg, bg, w1, b1, w2, b2 = params
    scores = jax.nn.softmax(x @ wg + bg, axis=-1)
    probs, indices = jax.lax.top_k(scores, TOP_K)
    out = jnp.zeros_like(x)
    for e in range(NUM_EXPERTS):
        h = jnp.maximum(x @ w1[e] + b1[e], 0.0)
        y = h @ w2[e] + b2[e]
        w_e = jnp.sum(jnp.where(indices == e, probs, 0.0), axis=-1, keepdims=True)
        out = out + w_e * y
    return out, scores


if __name__ == "__main__":
    key = jax.random.PRNGKey(0)
    k_param, k_x1, k_x2 = jax.random.split(key, 3)
    params = init_params(k_param)

    # Small batch: single full-dim block (grid of 1).
    B1 = 16
    x1 = jax.random.normal(k_x1, (B1, INPUT_DIM), jnp.float32)
    out1, scores1 = moe_forward(x1, params)
    jax.block_until_ready((out1, scores1))
    ref_out1, ref_scores1 = moe_reference(x1, params)
    assert jnp.allclose(out1, ref_out1, atol=1e-5, rtol=1e-5), "output mismatch (B=16)"
    assert jnp.allclose(scores1, ref_scores1, atol=1e-5, rtol=1e-5), "scores mismatch (B=16)"

    # Larger batch: exercises the 128-lane tiled grid path (3 steps, ragged tail).
    B2 = 272
    x2 = jax.random.normal(k_x2, (B2, INPUT_DIM), jnp.float32)
    out2, scores2 = moe_forward(x2, params)
    jax.block_until_ready((out2, scores2))
    ref_out2, ref_scores2 = moe_reference(x2, params)
    assert jnp.allclose(out2, ref_out2, atol=1e-5, rtol=1e-5), "output mismatch (B=272)"
    assert jnp.allclose(scores2, ref_scores2, atol=1e-5, rtol=1e-5), "scores mismatch (B=272)"

    print("KERNEL_OK")
</pallas_src>

<mosaic_0001>
module attributes {stable_mosaic.version = 11 : i64} {
  func.func @moe_kernel(%arg0: i32, %arg1: memref<10x16xf32, #tpu.memory_space<vmem>>, %arg2: memref<4x10xf32, #tpu.memory_space<vmem>>, %arg3: memref<4x1xf32, #tpu.memory_space<vmem>>, %arg4: memref<256x10xf32, #tpu.memory_space<vmem>>, %arg5: memref<256x1xf32, #tpu.memory_space<vmem>>, %arg6: memref<10x256xf32, #tpu.memory_space<vmem>>, %arg7: memref<10x4xf32, #tpu.memory_space<vmem>>, %arg8: memref<256x4xf32, #tpu.memory_space<vmem>>, %arg9: memref<10x16xf32, #tpu.memory_space<vmem>>, %arg10: memref<4x16xf32, #tpu.memory_space<vmem>>) attributes {dimension_semantics = [#tpu.dimension_semantics<parallel>], iteration_bounds = array<i64: 1>, scalar_prefetch = 0 : i64, scratch_operands = 0 : i64, tpu.core_type = #tpu.core_type<tc>, window_params = [{transform_indices = @transform_0, window_bounds = array<i64: 10, 16>}, {pipeline_mode = #tpu.pipeline_mode<synchronous>, transform_indices = @transform_1, window_bounds = array<i64: 4, 10>}, {pipeline_mode = #tpu.pipeline_mode<synchronous>, transform_indices = @transform_2, window_bounds = array<i64: 4, 1>}, {pipeline_mode = #tpu.pipeline_mode<synchronous>, transform_indices = @transform_3, window_bounds = array<i64: 256, 10>}, {pipeline_mode = #tpu.pipeline_mode<synchronous>, transform_indices = @transform_4, window_bounds = array<i64: 256, 1>}, {pipeline_mode = #tpu.pipeline_mode<synchronous>, transform_indices = @transform_5, window_bounds = array<i64: 10, 256>}, {pipeline_mode = #tpu.pipeline_mode<synchronous>, transform_indices = @transform_6, window_bounds = array<i64: 10, 4>}, {pipeline_mode = #tpu.pipeline_mode<synchronous>, transform_indices = @transform_7, window_bounds = array<i64: 256, 4>}, {transform_indices = @transform_8, window_bounds = array<i64: 10, 16>}, {transform_indices = @transform_9, window_bounds = array<i64: 4, 16>}]} {
    %c0 = arith.constant 0 : index
    %c0_0 = arith.constant 0 : index
    %0 = vector.load %arg1[%c0, %c0_0] : memref<10x16xf32, #tpu.memory_space<vmem>>, vector<10x16xf32>
    %c0_1 = arith.constant 0 : index
    %c0_2 = arith.constant 0 : index
    %1 = vector.load %arg2[%c0_1, %c0_2] : memref<4x10xf32, #tpu.memory_space<vmem>>, vector<4x10xf32>
    %cst = arith.constant dense<0.000000e+00> : vector<4x16xf32>
    %2 = tpu.matmul %1, %0, %cst {dimension_numbers = #tpu.dot_dimension_numbers<[1], [0], [0], [1], [0, 0, 1, 1], [], []>} : vector<4x10xf32>, vector<10x16xf32>, vector<4x16xf32> -> vector<4x16xf32>
    %c0_3 = arith.constant 0 : index
    %c0_4 = arith.constant 0 : index
    %3 = vector.load %arg3[%c0_3, %c0_4] : memref<4x1xf32, #tpu.memory_space<vmem>>, vector<4x1xf32>
    %4 = vector.broadcast %3 : vector<4x1xf32> to vector<4x16xf32>
    %5 = arith.addf %2, %4 : vector<4x16xf32>
    %cst_5 = arith.constant dense<0xFF800000> : vector<16xf32>
    %6 = vector.multi_reduction <maximumf>, %5, %cst_5 [0] : vector<4x16xf32> to vector<16xf32>
    %7 = vector.shape_cast %6 : vector<16xf32> to vector<1x16xf32>
    %8 = vector.broadcast %7 : vector<1x16xf32> to vector<4x16xf32>
    %9 = arith.subf %5, %8 : vector<4x16xf32>
    %10 = math.exp %9 : vector<4x16xf32>
    %cst_6 = arith.constant dense<0.000000e+00> : vector<16xf32>
    %11 = vector.multi_reduction <add>, %10, %cst_6 [0] : vector<4x16xf32> to vector<16xf32>
    %12 = vector.shape_cast %11 : vector<16xf32> to vector<1x16xf32>
    %13 = vector.broadcast %12 : vector<1x16xf32> to vector<4x16xf32>
    %14 = arith.divf %10, %13 : vector<4x16xf32>
    %c0_7 = arith.constant 0 : index
    %c0_8 = arith.constant 0 : index
    %15 = vector.load %arg10[%c0_7, %c0_8] : memref<4x16xf32, #tpu.memory_space<vmem>>, vector<4x16xf32>
    tpu.vector_store %arg10[%c0_7, %c0_8], %14 {strides = array<i32>} : memref<4x16xf32, #tpu.memory_space<vmem>>, vector<4x16xf32>,
    %16 = tpu.iota {dimensions = array<i32: 0>} : vector<4x16xi32>
    %cst_9 = arith.constant 0.000000e+00 : f32
    %17 = vector.broadcast %cst_9 : f32 to vector<4x16xf32>
    %cst_10 = arith.constant dense<0xFF800000> : vector<16xf32>
    %18 = vector.multi_reduction <maximumf>, %14, %cst_10 [0] : vector<4x16xf32> to vector<16xf32>
    %19 = vector.shape_cast %18 : vector<16xf32> to vector<1x16xf32>
    %20 = vector.broadcast %19 : vector<1x16xf32> to vector<4x16xf32>
    %21 = arith.cmpf oge, %14, %20 : vector<4x16xf32>
    %c4_i32 = arith.constant 4 : i32
    %22 = vector.broadcast %c4_i32 : i32 to vector<4x16xi32>
    %23 = arith.select %21, %16, %22 : vector<4x16xi1>, vector<4x16xi32>
    %cst_11 = arith.constant dense<2147483647> : vector<16xi32>
    %24 = vector.multi_reduction <minsi>, %23, %cst_11 [0] : vector<4x16xi32> to vector<16xi32>
    %25 = vector.shape_cast %24 : vector<16xi32> to vector<1x16xi32>
    %26 = vector.broadcast %25 : vector<1x16xi32> to vector<4x16xi32>
    %27 = arith.cmpi eq, %16, %26 : vector<4x16xi32>
    %cst_12 = arith.constant 0.000000e+00 : f32
    %28 = vector.broadcast %cst_12 : f32 to vector<4x16xf32>
    %29 = arith.select %27, %14, %28 : vector<4x16xi1>, vector<4x16xf32>
    %30 = arith.addf %17, %29 : vector<4x16xf32>
    %cst_13 = arith.constant 0xFF800000 : f32
    %31 = vector.broadcast %cst_13 : f32 to vector<4x16xf32>
    %32 = arith.select %27, %31, %14 : vector<4x16xi1>, vector<4x16xf32>
    %cst_14 = arith.constant dense<0xFF800000> : vector<16xf32>
    %33 = vector.multi_reduction <maximumf>, %32, %cst_14 [0] : vector<4x16xf32> to vector<16xf32>
    %34 = vector.shape_cast %33 : vector<16xf32> to vector<1x16xf32>
    %35 = vector.broadcast %34 : vector<1x16xf32> to vector<4x16xf32>
    %36 = arith.cmpf oge, %32, %35 : vector<4x16xf32>
    %c4_i32_15 = arith.constant 4 : i32
    %37 = vector.broadcast %c4_i32_15 : i32 to vector<4x16xi32>
    %38 = arith.select %36, %16, %37 : vector<4x16xi1>, vector<4x16xi32>
    %cst_16 = arith.constant dense<2147483647> : vector<16xi32>
    %39 = vector.multi_reduction <minsi>, %38, %cst_16 [0] : vector<4x16xi32> to vector<16xi32>
    %40 = vector.shape_cast %39 : vector<16xi32> to vector<1x16xi32>
    %41 = vector.broadcast %40 : vector<1x16xi32> to vector<4x16xi32>
    %42 = arith.cmpi eq, %16, %41 : vector<4x16xi32>
    %cst_17 = arith.constant 0.000000e+00 : f32
    %43 = vector.broadcast %cst_17 : f32 to vector<4x16xf32>
    %44 = arith.select %42, %14, %43 : vector<4x16xi1>, vector<4x16xf32>
    %45 = arith.addf %30, %44 : vector<4x16xf32>
    %c0_18 = arith.constant 0 : index
    %c0_19 = arith.constant 0 : index
    %46 = vector.load %arg4[%c0_18, %c0_19] : memref<256x10xf32, #tpu.memory_space<vmem>>, vector<256x10xf32>
    %cst_20 = arith.constant dense<0.000000e+00> : vector<256x16xf32>
    %47 = tpu.matmul %46, %0, %cst_20 {dimension_numbers = #tpu.dot_dimension_numbers<[1], [0], [0], [1], [0, 0, 1, 1], [], []>} : vector<256x10xf32>, vector<10x16xf32>, vector<256x16xf32> -> vector<256x16xf32>
    %c0_21 = arith.constant 0 : index
    %c0_22 = arith.constant 0 : index
    %48 = vector.load %arg5[%c0_21, %c0_22] : memref<256x1xf32, #tpu.memory_space<vmem>>, vector<256x1xf32>
    %49 = vector.broadcast %48 : vector<256x1xf32> to vector<256x16xf32>
    %50 = arith.addf %47, %49 : vector<256x16xf32>
    %cst_23 = arith.constant 0.000000e+00 : f32
    %51 = vector.broadcast %cst_23 : f32 to vector<256x16xf32>
    %52 = arith.maximumf %50, %51 : vector<256x16xf32>
    %c0_24 = arith.constant 0 : index
    %c0_25 = arith.constant 0 : index
    %53 = vector.load %arg8[%c0_24, %c0_25] : memref<256x4xf32, #tpu.memory_space<vmem>>, vector<256x4xf32>
    %cst_26 = arith.constant dense<0.000000e+00> : vector<256x16xf32>
    %54 = tpu.matmul %53, %45, %cst_26 {dimension_numbers = #tpu.dot_dimension_numbers<[1], [0], [0], [1], [0, 0, 1, 1], [], []>} : vector<256x4xf32>, vector<4x16xf32>, vector<256x16xf32> -> vector<256x16xf32>
    %55 = arith.mulf %52, %54 : vector<256x16xf32>
    %c0_27 = arith.constant 0 : index
    %c0_28 = arith.constant 0 : index
    %56 = vector.load %arg6[%c0_27, %c0_28] : memref<10x256xf32, #tpu.memory_space<vmem>>, vector<10x256xf32>
    %cst_29 = arith.constant dense<0.000000e+00> : vector<10x16xf32>
    %57 = tpu.matmul %56, %55, %cst_29 {dimension_numbers = #tpu.dot_dimension_numbers<[1], [0], [0], [1], [0, 0, 1, 1], [], []>} : vector<10x256xf32>, vector<256x16xf32>, vector<10x16xf32> -> vector<10x16xf32>
    %c0_30 = arith.constant 0 : index
    %c0_31 = arith.constant 0 : index
    %58 = vector.load %arg7[%c0_30, %c0_31] : memref<10x4xf32, #tpu.memory_space<vmem>>, vector<10x4xf32>
    %cst_32 = arith.constant dense<0.000000e+00> : vector<10x16xf32>
    %59 = tpu.matmul %58, %45, %cst_32 {dimension_numbers = #tpu.dot_dimension_numbers<[1], [0], [0], [1], [0, 0, 1, 1], [], []>} : vector<10x4xf32>, vector<4x16xf32>, vector<10x16xf32> -> vector<10x16xf32>
    %60 = arith.addf %57, %59 : vector<10x16xf32>
    %c0_33 = arith.constant 0 : index
    %c0_34 = arith.constant 0 : index
    %61 = vector.load %arg9[%c0_33, %c0_34] : memref<10x16xf32, #tpu.memory_space<vmem>>, vector<10x16xf32>
    tpu.vector_store %arg9[%c0_33, %c0_34], %60 {strides = array<i32>} : memref<10x16xf32, #tpu.memory_space<vmem>>, vector<10x16xf32>,
    return
  }
  func.func @transform_0(%arg0: i32) -> (i32, i32) {
    %c0_i32 = arith.constant 0 : i32
    %c0_i32_0 = arith.constant 0 : i32
    return %c0_i32, %arg0 : i32, i32
  }
  func.func @transform_1(%arg0: i32) -> (i32, i32) {
    %c0_i32 = arith.constant 0 : i32
    %c0_i32_0 = arith.constant 0 : i32
    %c0_i32_1 = arith.constant 0 : i32
    return %c0_i32, %c0_i32_0 : i32, i32
  }
  func.func @transform_2(%arg0: i32) -> (i32, i32) {
    %c0_i32 = arith.constant 0 : i32
    %c0_i32_0 = arith.constant 0 : i32
    %c0_i32_1 = arith.constant 0 : i32
    return %c0_i32, %c0_i32_0 : i32, i32
  }
  func.func @transform_3(%arg0: i32) -> (i32, i32) {
    %c0_i32 = arith.constant 0 : i32
    %c0_i32_0 = arith.constant 0 : i32
    %c0_i32_1 = arith.constant 0 : i32
    return %c0_i32, %c0_i32_0 : i32, i32
  }
  func.func @transform_4(%arg0: i32) -> (i32, i32) {
    %c0_i32 = arith.constant 0 : i32
    %c0_i32_0 = arith.constant 0 : i32
    %c0_i32_1 = arith.constant 0 : i32
    return %c0_i32, %c0_i32_0 : i32, i32
  }
  func.func @transform_5(%arg0: i32) -> (i32, i32) {
    %c0_i32 = arith.constant 0 : i32
    %c0_i32_0 = arith.constant 0 : i32
    %c0_i32_1 = arith.constant 0 : i32
    return %c0_i32, %c0_i32_0 : i32, i32
  }
  func.func @transform_6(%arg0: i32) -> (i32, i32) {
    %c0_i32 = arith.constant 0 : i32
    %c0_i32_0 = arith.constant 0 : i32
    %c0_i32_1 = arith.constant 0 : i32
    return %c0_i32, %c0_i32_0 : i32, i32
  }
  func.func @transform_7(%arg0: i32) -> (i32, i32) {
    %c0_i32 = arith.constant 0 : i32
    %c0_i32_0 = arith.constant 0 : i32
    %c0_i32_1 = arith.constant 0 : i32
    return %c0_i32, %c0_i32_0 : i32, i32
  }
  func.func @transform_8(%arg0: i32) -> (i32, i32) {
    %c0_i32 = arith.constant 0 : i32
    %c0_i32_0 = arith.constant 0 : i32
    return %c0_i32, %arg0 : i32, i32
  }
  func.func @transform_9(%arg0: i32) -> (i32, i32) {
    %c0_i32 = arith.constant 0 : i32
    %c0_i32_0 = arith.constant 0 : i32
    return %c0_i32, %arg0 : i32, i32
  }
}

</mosaic_0001>

<bundles_post_ra>
// kernel: tpu_custom_call.1
= control target key start
LH: loop header
LB: loop body
LE: loop exit
PB: predicated region body
PF: predicated region fallthrough
CT: control target
= control target key end

     0   :  { %15 = vsyncpa [#allocation3], 0  ;;  %vm46_vm0 = vcmask 1041408   ;;  %v1704_v1 = vmov 0.0   ;;  %vm1705_vm1 = vmmov 0   ;;  %vm42_vm2 = vcmask 80896   ;;  %s2349_s0 = inlined_call_operand.vmem [shape: f32[10,16], index: 0, kind: input, shape index: {}]   ;;  %s2350_s1 = inlined_call_operand.vmem [shape: f32[4,10], index: 1, kind: input, shape index: {}]   ;;  %s2351_s2 = inlined_call_operand.vmem [shape: f32[4,1], index: 2, kind: input, shape index: {}]   ;;  %s2352_s3 = inlined_call_operand.vmem [shape: f32[256,10], index: 3, kind: input, shape index: {}]   ;;  %s2353_s4 = inlined_call_operand.vmem [shape: f32[256,1], index: 4, kind: input, shape index: {}]   ;;  %s2354_s5 = inlined_call_operand.vmem [shape: f32[10,256], index: 5, kind: input, shape index: {}]   ;;  %s2355_s6 = inlined_call_operand.vmem [shape: f32[10,4], index: 6, kind: input, shape index: {}]   ;;  %s2356_s7 = inlined_call_operand.vmem [shape: f32[256,4], index: 7, kind: input, shape index: {}]   ;;  %s2357_s8 = inlined_call_operand.hbm [shape: f32[10,16], index: 8, kind: output, shape index: {0}]   ;;  %s2358_s9 = inlined_call_operand.hbm [shape: f32[4,16], index: 9, kind: output, shape index: {1}]  }
   0x1   :  { %v34_v0 = vld [vmem:[%s2349_s0 + $0x8] sm:$0x3]  ;;  %1533 = vmatprep.subr.mxu1 %v1704_v1  ;;  %v33_v2 = vld [vmem:[%s2349_s0] sm:$0xff]  ;;  %1537 = vmatprep.mubr.msk.f32.mxu1 %vm1705_vm1, %v1704_v1  ;;  %v1706_v4 = vmov 0   ;;  %v251_v7 = vld [vmem:[%s2353_s4 + $0xf8] sm:$0xff] }
   0x2   :  { %1534 = vmatpush3.msk.msra.mxu1 %vm46_vm0, %v34_v0  ;;  %v35_v3 = vld [vmem:[%s2350_s1] sm:$0xf]  ;;  %1654 = vset.pattern.permute.xlu0 %v1706_v4  ;;  %v189_v8 = vld [vmem:[%s2352_s3 + $0x8] sm:$0xff]  ;;  %v190_v9 = vld [vmem:[%s2352_s3 + $0x10] sm:$0xff] }
   0x3   :  { %v36_v5 = vld [vmem:[%s2351_s2] sm:$0xf]  ;;  %1535 = vmatprep.subr.mxu1 %v1704_v1  ;;  %1655 = vset.pattern.permute.xlu1 %v1706_v4  ;;  %v234_v10 = vld [vmem:[%s2353_s4 + $0x70] sm:$0xff]  ;;  %v191_v11 = vld [vmem:[%s2352_s3 + $0x18] sm:$0xff] }
   0x4   :  { %v188_v6 = vld [vmem:[%s2352_s3] sm:$0xff]  ;;  %39 = vperm.xlu0 %1654, %v36_v5   ;;  %1536 = vmatpush3.msra.mxu1 %v33_v2  ;;  %v233_v13 = vld [vmem:[%s2353_s4 + $0x68] sm:$0xff]  ;;  %v194_v15 = vld [vmem:[%s2352_s3 + $0x30] sm:$0xff] }
   0x5   :  { %1538 = vmatmul.mubr.msk.f32.vlgmr.msra.gmra.mxu1 %vm42_vm2, %v35_v3  ;;  %1540 = vmatprep.subr.msk.mxu1 %vm46_vm0, %v34_v0  ;;  %v192_v12 = vld [vmem:[%s2352_s3 + $0x20] sm:$0xff]  ;;  %v193_v14 = vld [vmem:[%s2352_s3 + $0x28] sm:$0xff] }
   0x6   :  { %1541 = vmatpush3.msk.msra.mxu1 %vm46_vm0, %v34_v0  ;;  %1544 = vmatprep.mubr.msk.f32.mxu1 %vm42_vm2, %v188_v6  ;;  %v232_v16 = vld [vmem:[%s2353_s4 + $0x60] sm:$0xff] }
   0x7   :  { %1542 = vmatprep.subr.mxu1 %v33_v2 }
   0x8   :  { %409 = vperm.xlu0 %1654, %v251_v7   ;;  %1543 = vmatpush3.msra.mxu1 %v33_v2 }
   0x9   :  { %1545 = vmatmul.mubr.msk.f32.vlgmr.msra.gmra.mxu1 %vm42_vm2, %v189_v8 }
   0xa   :  { %1547 = vmatprep.mubr.msk.f32.mxu1 %vm42_vm2, %v190_v9 }
   0xc   :  { %324 = vperm.xlu0 %1654, %v234_v10  }
   0xd   :  { %1548 = vmatmul.mubr.msk.f32.gmra.mxu1 %vm42_vm2, %v191_v11 }
   0xe   :  { %1550 = vmatprep.mubr.msk.f32.mxu1 %vm42_vm2, %v192_v12 }
  0x10   :  { %319 = vperm.xlu0 %1654, %v233_v13  }
  0x11   :  { %1551 = vmatmul.mubr.msk.f32.gmra.mxu1 %vm42_vm2, %v193_v14 }
  0x12   :  { %16 = vsyncpa [#allocation5], 0  ;;  %1553 = vmatprep.mubr.msk.f32.mxu1 %vm42_vm2, %v194_v15  ;;  %v195_v17 = vld [vmem:[%s2352_s3 + $0x38] sm:$0xff]  ;;  %v196_v18 = vld [vmem:[%s2352_s3 + $0x40] sm:$0xff]  ;;  %vm797_vm3 = vcmask 31744   ;;  %vm120_vm4 = vcmask 125952  }
  0x13   :  { %v231_v19 = vld [vmem:[%s2353_s4 + $0x58] sm:$0xff]  ;;  %v197_v20 = vld [vmem:[%s2352_s3 + $0x48] sm:$0xff]  ;;  %v198_v21 = vld [vmem:[%s2352_s3 + $0x50] sm:$0xff]  ;;  %vm894_vm15 = vcmask 1043456   ;;  %s1707_s0 = smov [#allocation4]  }
  0x14   :  { %314 = vperm.xlu0 %1654, %v232_v16   ;;  %v230_v22 = vld [vmem:[%s2353_s4 + $0x50] sm:$0xff]  ;;  %v199_v23 = vld [vmem:[%s2352_s3 + $0x58] sm:$0xff]  ;;  %v200_v24 = vld [vmem:[%s2352_s3 + $0x60] sm:$0xff]  ;;  %s1339_s19 = sshll.u32 %s1707_s0, 4  ;;  %s1340_s19 = int_to_ptr.vmem [resolvable:$true] %s1339_s19 }
  0x15   :  { %1554 = vmatmul.mubr.msk.f32.gmra.mxu1 %vm42_vm2, %v195_v17  ;;  %v229_v25 = vld [vmem:[%s2353_s4 + $0x48] sm:$0xff]  ;;  %v202_v27 = vld [vmem:[%s2352_s3 + $0x70] sm:$0xff]  ;;  %v228_v28 = vld [vmem:[%s2353_s4 + $0x40] sm:$0xff]  ;;  %s1660_s1 = scalar_lea.vmem %s1340_s19, 64  ;;  %p1665_p1 = scmp.lt.s32.totalorder %s1340_s19, %s1340_s19 }
  0x16   :  { %1556 = vmatprep.mubr.msk.f32.mxu1 %vm42_vm2, %v196_v18  ;;  %v201_v26 = vld [vmem:[%s2352_s3 + $0x68] sm:$0xff]  ;;  %v203_v29 = vld [vmem:[%s2352_s3 + $0x78] sm:$0xff]  ;;  %v204_v30 = vld [vmem:[%s2352_s3 + $0x80] sm:$0xff]  ;;  %p1661_p0 = scmp.ne.s32.totalorder %s1340_s19, %s1660_s1  ;;  %p1666_p2 = scmp.lt.s32.totalorder %s1660_s1, %s1660_s1 }
  0x17   :  { %v227_v31 = vld [vmem:[%s2353_s4 + $0x38] sm:$0xff]  ;;  %v205_v32 = vld [vmem:[%s2352_s3 + $0x88] sm:$0xff]  ;;  %v206_v33 = vld [vmem:[%s2352_s3 + $0x90] sm:$0xff] }
  0x18   :  { %309 = vperm.xlu0 %1654, %v231_v19   ;;  %v226_v34 = vld [vmem:[%s2353_s4 + $0x30] sm:$0xff]  ;;  %v207_v35 = vld [vmem:[%s2352_s3 + $0x98] sm:$0xff]  ;;  %v208_v36 = vld [vmem:[%s2352_s3 + $0xa0] sm:$0xff]  ;;  %p1667_p3 = por %p1666_p2, %p1665_p1 }
  0x19   :  { %1557 = vmatmul.mubr.msk.f32.gmra.mxu1 %vm42_vm2, %v197_v20  ;;  %v225_v37 = vld [vmem:[%s2353_s4 + $0x28] sm:$0xff]  ;;  %v210_v39 = vld [vmem:[%s2352_s3 + $0xb0] sm:$0xff]  ;;  %v224_v40 = vld [vmem:[%s2353_s4 + $0x20] sm:$0xff] }
  0x1a   :  { %1559 = vmatprep.mubr.msk.f32.mxu1 %vm42_vm2, %v198_v21  ;;  %v209_v38 = vld [vmem:[%s2352_s3 + $0xa8] sm:$0xff]  ;;  %v211_v41 = vld [vmem:[%s2352_s3 + $0xb8] sm:$0xff]  ;;  %v212_v42 = vld [vmem:[%s2352_s3 + $0xc0] sm:$0xff]  ;;  %p1668_p4 = pnand %p1667_p3, %p1661_p0 }
  0x1b   :  { %v223_v43 = vld [vmem:[%s2353_s4 + $0x18] sm:$0xff]  ;;  %v213_v44 = vld [vmem:[%s2352_s3 + $0xc8] sm:$0xff]  ;;  %v214_v45 = vld [vmem:[%s2352_s3 + $0xd0] sm:$0xff] }
  0x1c   :  { %304 = vperm.xlu0 %1654, %v230_v22   ;;  %v222_v46 = vld [vmem:[%s2353_s4 + $0x10] sm:$0xff]  ;;  %v215_v47 = vld [vmem:[%s2352_s3 + $0xd8] sm:$0xff]  ;;  %v216_v48 = vld [vmem:[%s2352_s3 + $0xe0] sm:$0xff] }
  0x1d   :  { %1560 = vmatmul.mubr.msk.f32.gmra.mxu1 %vm42_vm2, %v199_v23  ;;  %v221_v49 = vld [vmem:[%s2353_s4 + $0x8] sm:$0xff]  ;;  %v218_v51 = vld [vmem:[%s2352_s3 + $0xf0] sm:$0xff]  ;;  %v220_v52 = vld [vmem:[%s2353_s4] sm:$0xff] }
  0x1e   :  { %1562 = vmatprep.mubr.msk.f32.mxu1 %vm42_vm2, %v200_v24  ;;  %v217_v50 = vld [vmem:[%s2352_s3 + $0xe8] sm:$0xff]  ;;  %v219_v53 = vld [vmem:[%s2352_s3 + $0xf8] sm:$0xff]  ;;  %v765_v54 = vld [vmem:[%s2356_s7] sm:$0xff] }
  0x1f   :  { %1594 = vmatprep.mubr.msk.f32.mxu0 %vm797_vm3, %v765_v54  ;;  %v235_v5 = vld [vmem:[%s2353_s4 + $0x78] sm:$0xff]  ;;  %v250_v9 = vld [vmem:[%s2353_s4 + $0xf0] sm:$0xff]  ;;  %v249_v12 = vld [vmem:[%s2353_s4 + $0xe8] sm:$0xff] }
  0x20   :  { %299 = vperm.xlu0 %1654, %v229_v25   ;;  %329 = vperm.xlu1 %1655, %v235_v5   ;;  %v248_v15 = vld [vmem:[%s2353_s4 + $0xe0] sm:$0xff]  ;;  %v247_v16 = vld [vmem:[%s2353_s4 + $0xd8] sm:$0xff]  ;;  %v246_v17 = vld [vmem:[%s2353_s4 + $0xd0] sm:$0xff] }
  0x21   :  { %1563 = vmatmul.mubr.msk.f32.gmra.mxu1 %vm42_vm2, %v201_v26  ;;  %v245_v18 = vld [vmem:[%s2353_s4 + $0xc8] sm:$0xff]  ;;  %v244_v19 = vld [vmem:[%s2353_s4 + $0xc0] sm:$0xff]  ;;  %v243_v23 = vld [vmem:[%s2353_s4 + $0xb8] sm:$0xff] }
  0x22   :  { %1565 = vmatprep.mubr.msk.f32.mxu1 %vm42_vm2, %v202_v27  ;;  %v242_v26 = vld [vmem:[%s2353_s4 + $0xb0] sm:$0xff]  ;;  %v769_v5 = vld [vmem:[%s2356_s7 + $0x20] sm:$0xff] }
  0x24   :  { %294 = vperm.xlu0 %1654, %v228_v28   ;;  %404 = vperm.xlu1 %1655, %v250_v9   ;;  %v141_v28 = vlaneseq  ;;  %v773_v9 = vld [vmem:[%s2356_s7 + $0x40] sm:$0xff] }
  0x25   :  { %1566 = vmatmul.mubr.msk.f32.gmra.mxu1 %vm42_vm2, %v203_v29 }
  0x26   :  { %1568 = vmatprep.mubr.msk.f32.mxu1 %vm42_vm2, %v204_v30  ;;  %v241_v30 = vld [vmem:[%s2353_s4 + $0xa8] sm:$0xff] }
  0x28   :  { %289 = vperm.xlu0 %1654, %v227_v31   ;;  %399 = vperm.xlu1 %1655, %v249_v12   ;;  %v776_v12 = vld [vmem:[%s2356_s7 + $0x58] sm:$0xff] }
  0x29   :  { %1569 = vmatmul.mubr.msk.f32.gmra.mxu1 %vm42_vm2, %v205_v32  ;;  %v142_v32 = vshrl.u32 %v141_v28, 7  ;;  %v792_v28 = vld [vmem:[%s2356_s7 + $0xd8] sm:$0xff] }
  0x2a   :  { %1571 = vmatprep.mubr.msk.f32.mxu1 %vm42_vm2, %v206_v33 }
  0x2c   :  { %284 = vperm.xlu0 %1654, %v226_v34   ;;  %394 = vperm.xlu1 %1655, %v248_v15   ;;  %v240_v34 = vld [vmem:[%s2353_s4 + $0xa0] sm:$0xff]  ;;  %v779_v15 = vld [vmem:[%s2356_s7 + $0x70] sm:$0xff] }
  0x2d   :  { %1572 = vmatmul.mubr.msk.f32.gmra.mxu1 %vm42_vm2, %v207_v35 }
  0x2e   :  { %1574 = vmatprep.mubr.msk.f32.mxu1 %vm42_vm2, %v208_v36 }
  0x30   :  { %279 = vperm.xlu0 %1654, %v225_v37   ;;  %389 = vperm.xlu1 %1655, %v247_v16   ;;  %v780_v16 = vld [vmem:[%s2356_s7 + $0x78] sm:$0xff] }
  0x31   :  { %1575 = vmatmul.mubr.msk.f32.gmra.mxu1 %vm42_vm2, %v209_v38  ;;  %v239_v38 = vld [vmem:[%s2353_s4 + $0x98] sm:$0xff] }
  0x32   :  { %1577 = vmatprep.mubr.msk.f32.mxu1 %vm42_vm2, %v210_v39 }
  0x34   :  { %274 = vperm.xlu0 %1654, %v224_v40   ;;  %384 = vperm.xlu1 %1655, %v246_v17   ;;  %v781_v17 = vld [vmem:[%s2356_s7 + $0x80] sm:$0xff] }
  0x35   :  { %1578 = vmatmul.mubr.msk.f32.gmra.mxu1 %vm42_vm2, %v211_v41  ;;  %v238_v41 = vld [vmem:[%s2353_s4 + $0x90] sm:$0xff] }
  0x36   :  { %1580 = vmatprep.mubr.msk.f32.mxu1 %vm42_vm2, %v212_v42 }
  0x38   :  { %269 = vperm.xlu0 %1654, %v223_v43   ;;  %379 = vperm.xlu1 %1655, %v245_v18   ;;  %v782_v18 = vld [vmem:[%s2356_s7 + $0x88] sm:$0xff] }
  0x39   :  { %1581 = vmatmul.mubr.msk.f32.gmra.mxu1 %vm42_vm2, %v213_v44  ;;  %v237_v44 = vld [vmem:[%s2353_s4 + $0x88] sm:$0xff] }
  0x3a   :  { %1583 = vmatprep.mubr.msk.f32.mxu1 %vm42_vm2, %v214_v45 }
  0x3c   :  { %264 = vperm.xlu0 %1654, %v222_v46   ;;  %374 = vperm.xlu1 %1655, %v244_v19   ;;  %v236_v46 = vld [vmem:[%s2353_s4 + $0x80] sm:$0xff]  ;;  %v783_v19 = vld [vmem:[%s2356_s7 + $0x90] sm:$0xff] }
  0x3d   :  { %1584 = vmatmul.mubr.msk.f32.gmra.mxu1 %vm42_vm2, %v215_v47 }
  0x3e   :  { %1586 = vmatprep.mubr.msk.f32.mxu1 %vm42_vm2, %v216_v48 }
  0x40   :  { %259 = vperm.xlu0 %1654, %v221_v49   ;;  %369 = vperm.xlu1 %1655, %v243_v23   ;;  %v787_v23 = vld [vmem:[%s2356_s7 + $0xb0] sm:$0xff] }
  0x41   :  { %1587 = vmatmul.mubr.msk.f32.gmra.mxu1 %vm42_vm2, %v217_v50 }
  0x42   :  { %1589 = vmatprep.mubr.msk.f32.mxu1 %vm42_vm2, %v218_v51 }
  0x44   :  { %254 = vperm.xlu0 %1654, %v220_v52   ;;  %364 = vperm.xlu1 %1655, %v242_v26   ;;  %v790_v26 = vld [vmem:[%s2356_s7 + $0xc8] sm:$0xff] }
  0x45   :  { %1590 = vmatmul.mubr.msk.f32.gmra.mxu1 %vm42_vm2, %v219_v53 }
  0x48   :  { %359 = vperm.xlu1 %1655, %v241_v30   ;;  %v794_v30 = vld [vmem:[%s2356_s7 + $0xe8] sm:$0xff] }
  0x4c   :  { %354 = vperm.xlu1 %1655, %v240_v34  }
  0x50   :  { %349 = vperm.xlu1 %1655, %v239_v38  }
  0x54   :  { %344 = vperm.xlu1 %1655, %v238_v41  }
  0x58   :  { %339 = vperm.xlu1 %1655, %v237_v44  }
  0x5c   :  { %334 = vperm.xlu1 %1655, %v236_v46  }
  0x7f   :  { %v40_v55 = vpop.permute.xlu0 %39 }
  0xc5   :  { %v116_v56 = vpop.f32.mrf.mxu1 }
  0xc6   :  { %v117_v57 = vadd.f32 %v116_v56, %v40_v55 }
  0xc7   :  { %v1539_v58 = vpop.f32.mrf.mxu1 }
  0xc8   :  { %v121_v59 = vsel %vm120_vm4, %v117_v57, -inf }
  0xc9   :  { %v122_v60 = vrot.slane %v121_v59, 4  ;;  %v1546_v38 = vpop.f32.mrf.mxu1 }
  0xcb   :  { %v123_v61 = vmax.f32 %v121_v59, %v122_v60 }
  0xcd   :  { %v124_v62 = vrot.slane %v123_v61, 2 }
  0xcf   :  { %v125_v63 = vmax.f32 %v123_v61, %v124_v62 }
  0xd1   :  { %v126_v0 = vrot.slane %v125_v63, 1 }
  0xd3   :  { %v127_v1 = vmax.f32 %v125_v63, %v126_v0 }
  0xd5   :  { %v128_v2 = vsub.f32 %v117_v57, %v127_v1 }
  0xd7   :  { %v129_v3 = vmul.f32 1.442695, %v128_v2  ;;  %v766_v2 = vld [vmem:[%s2356_s7 + $0x8] sm:$0xff] }
  0xd9   :  { %1656 = vpow2.f32 %v129_v3  ;;  %v767_v3 = vld [vmem:[%s2356_s7 + $0x10] sm:$0xff] }
  0xe6   :  { %v1657_v4 = vpop.eup %1656 }
  0xe7   :  { %v131_v6 = vsel %vm120_vm4, %v1657_v4, 0.0 }
  0xe8   :  { %v132_v7 = vrot.slane %v131_v6, 4 }
  0xea   :  { %v133_v8 = vadd.f32 %v132_v7, %v131_v6  ;;  %v770_v6 = vld [vmem:[%s2356_s7 + $0x28] sm:$0xff]  ;;  %v771_v7 = vld [vmem:[%s2356_s7 + $0x30] sm:$0xff] }
  0xec   :  { %v134_v10 = vrot.slane %v133_v8, 2 }
  0xee   :  { %v135_v11 = vadd.f32 %v134_v10, %v133_v8  ;;  %v772_v8 = vld [vmem:[%s2356_s7 + $0x38] sm:$0xff]  ;;  %v774_v10 = vld [vmem:[%s2356_s7 + $0x48] sm:$0xff] }
  0xf0   :  { %v136_v13 = vrot.slane %v135_v11, 1 }
  0xf2   :  { %v137_v14 = vadd.f32 %v136_v13, %v135_v11  ;;  %v775_v11 = vld [vmem:[%s2356_s7 + $0x50] sm:$0xff]  ;;  %v777_v13 = vld [vmem:[%s2356_s7 + $0x60] sm:$0xff] }
  0xf4   :  { %1658 = vrcp.f32 %v137_v14  ;;  %v778_v14 = vld [vmem:[%s2356_s7 + $0x68] sm:$0xff] }
 0x101   :  { %v1659_v20 = vpop.eup %1658 }
 0x102   :  { %v1983_v21 = vmul.f32 %v1659_v20, %v1657_v4  ;;  %v768_v4 = vld [vmem:[%s2356_s7 + $0x18] sm:$0xff] }
 0x103   :  { %v784_v20 = vld [vmem:[%s2356_s7 + $0x98] sm:$0xff] }
 0x104   :  { %140 = vst.msk [vmem:[#allocation4] sm:$0xf] %vm120_vm4, %v1983_v21  ;;  %v143_v22 = vsel %vm120_vm4, %v1983_v21, -inf }
 0x105   :  { %v144_v24 = vrot.slane %v143_v22, 4 }
 0x107   :  { %v145_v25 = vmax.f32 %v143_v22, %v144_v24  ;;  %v786_v22 = vld [vmem:[%s2356_s7 + $0xa8] sm:$0xff]  ;;  %v788_v24 = vld [vmem:[%s2356_s7 + $0xb8] sm:$0xff] }
 0x109   :  { %v146_v27 = vrot.slane %v145_v25, 2 }
 0x10b   :  { %v147_v29 = vmax.f32 %v145_v25, %v146_v27  ;;  %v789_v25 = vld [vmem:[%s2356_s7 + $0xc0] sm:$0xff]  ;;  %v791_v27 = vld [vmem:[%s2356_s7 + $0xd0] sm:$0xff] }
 0x10d   :  { %v148_v31 = vrot.slane %v147_v29, 1 }
 0x10f   :  { %v149_v33 = vmax.f32 %v147_v29, %v148_v31  ;;  %v793_v29 = vld [vmem:[%s2356_s7 + $0xe0] sm:$0xff]  ;;  %v795_v31 = vld [vmem:[%s2356_s7 + $0xf0] sm:$0xff] }
 0x111   :  { %vm150_vm5 = vcmp.ge.f32.partialorder %v1983_v21, %v149_v33  ;;  %v2146_v33 = vpop.permute.xlu0 %409 }
 0x112   :  { %v151_v35 = vsel %vm150_vm5, %v142_v32, 4 }
 0x113   :  { %v152_v36 = vsel %vm120_vm4, %v151_v35, 2147483647 }
 0x114   :  { %v153_v37 = vrot.slane %v152_v36, 4 }
 0x115   :  { %v2148_v34 = vpop.permute.xlu0 %324 }
 0x116   :  { %vm154_vm6 = vcmp.lt.s32.totalorder %v152_v36, %v153_v37 }
 0x117   :  { %v155_v39 = vsel %vm154_vm6, %v152_v36, %v153_v37 }
 0x118   :  { %v156_v40 = vrot.slane %v155_v39, 2 }
 0x119   :  { %v2150_v35 = vpop.permute.xlu0 %319 }
 0x11a   :  { %vm157_vm7 = vcmp.lt.s32.totalorder %v155_v39, %v156_v40 }
 0x11b   :  { %v158_v42 = vsel %vm157_vm7, %v155_v39, %v156_v40  ;;  %v574_v39 = vpop.f32.mrf.mxu1 }
 0x11c   :  { %v159_v43 = vrot.slane %v158_v42, 1 }
 0x11d   :  { %v2152_v36 = vpop.permute.xlu0 %314  ;;  %v1549_v41 = vpop.f32.mrf.mxu1 }
 0x11e   :  { %vm160_vm8 = vcmp.lt.s32.totalorder %v158_v42, %v159_v43 }
 0x11f   :  { %v161_v45 = vsel %vm160_vm8, %v158_v42, %v159_v43  ;;  %v584_v43 = vpop.f32.mrf.mxu1 }
 0x120   :  { %vm162_vm9 = vcmp.eq.s32.totalorder %v142_v32, %v161_v45 }
 0x121   :  { %v165_v47 = vsel %vm162_vm9, -inf, %v1983_v21  ;;  %v163_v63 = vsel %vm162_vm9, %v1983_v21, 0.0  ;;  %v2154_v37 = vpop.permute.xlu0 %309  ;;  %v1552_v44 = vpop.f32.mrf.mxu1 }
 0x122   :  { %v166_v48 = vsel %vm120_vm4, %v165_v47, -inf }
 0x123   :  { %v167_v49 = vrot.slane %v166_v48, 4  ;;  %v594_v46 = vpop.f32.mrf.mxu1 }
 0x125   :  { %v168_v50 = vmax.f32 %v166_v48, %v167_v49  ;;  %v2156_v40 = vpop.permute.xlu0 %304  ;;  %v1555_v48 = vpop.f32.mrf.mxu1 }
 0x127   :  { %v169_v51 = vrot.slane %v168_v50, 2  ;;  %v604_v49 = vpop.f32.mrf.mxu1 }
 0x129   :  { %v170_v52 = vmax.f32 %v168_v50, %v169_v51  ;;  %v2158_v42 = vpop.permute.xlu0 %299  ;;  %v2162_v51 = vpop.f32.mrf.mxu1 }
 0x12b   :  { %v171_v53 = vrot.slane %v170_v52, 1 }
 0x12d   :  { %v172_v54 = vmax.f32 %v170_v52, %v171_v53  ;;  %v2160_v45 = vpop.permute.xlu0 %294  ;;  %v1156_v52 = vld [vmem:[%s2354_s5 + $0x8] sm:$0xff] }
 0x12f   :  { %vm173_vm10 = vcmp.ge.f32.partialorder %v165_v47, %v172_v54  ;;  %v2167_v54 = vpop.f32.mrf.mxu1 }
 0x130   :  { %v174_v55 = vsel %vm173_vm10, %v142_v32, 4 }
 0x131   :  { %v175_v56 = vsel %vm120_vm4, %v174_v55, 2147483647  ;;  %v290_v47 = vpop.permute.xlu0 %289  ;;  %v1159_v55 = vld [vmem:[%s2355_s6] sm:$0xff] }
 0x132   :  { %v176_v57 = vrot.slane %v175_v56, 4  ;;  %1644 = vmatprep.mubr.msk.f32.mxu1 %vm797_vm3, %v1159_v55 }
 0x134   :  { %vm177_vm11 = vcmp.lt.s32.totalorder %v175_v56, %v176_v57 }
 0x135   :  { %v178_v58 = vsel %vm177_vm11, %v175_v56, %v176_v57  ;;  %v285_v50 = vpop.permute.xlu0 %284  ;;  %v1160_v56 = vld [vmem:[%s2355_s6 + $0x8] sm:$0x3]  ;;  %v2177_v57 = vpop.f32.mrf.mxu1 }
 0x136   :  { %v179_v59 = vrot.slane %v178_v58, 2 }
 0x138   :  { %vm180_vm12 = vcmp.lt.s32.totalorder %v178_v58, %v179_v59 }
 0x139   :  { %v181_v60 = vsel %vm180_vm12, %v178_v58, %v179_v59  ;;  %v280_v53 = vpop.permute.xlu0 %279  ;;  %v2179_v59 = vpop.f32.mrf.mxu1 }
 0x13a   :  { %v182_v61 = vrot.slane %v181_v60, 1 }
 0x13c   :  { %vm183_vm13 = vcmp.lt.s32.totalorder %v181_v60, %v182_v61 }
 0x13d   :  { %v184_v62 = vsel %vm183_vm13, %v181_v60, %v182_v61  ;;  %v275_v58 = vpop.permute.xlu0 %274  ;;  %v2181_v61 = vpop.f32.mrf.mxu1 }
 0x13e   :  { %vm185_vm14 = vcmp.eq.s32.totalorder %v142_v32, %v184_v62  ;;  %v796_v32 = vld [vmem:[%s2356_s7 + $0xf8] sm:$0xff] }
 0x13f   :  { %v186_v0 = vsel %vm185_vm14, %v1983_v21, 0.0  ;;  %v785_v21 = vld [vmem:[%s2356_s7 + $0xa0] sm:$0xff]  ;;  %v2183_v62 = vpop.f32.mrf.mxu1 }
 0x140   :  { %v187_v1 = vadd.f32 %v186_v0, %v163_v63 }
 0x141   :  { %v270_v60 = vpop.permute.xlu0 %269  ;;  %v2185_v0 = vpop.f32.mrf.mxu1 }
 0x142   :  { %1592 = vmatprep.subr.msk.mxu0 %vm894_vm15, %v187_v1  ;;  %1642 = vmatprep.subr.msk.mxu1 %vm894_vm15, %v187_v1 }
 0x143   :  { %1593 = vmatpush3.msk.msra.mxu0 %vm894_vm15, %v187_v1  ;;  %1643 = vmatpush3.msk.msra.mxu1 %vm894_vm15, %v187_v1 }
 0x144   :  { %1595 = vmatmul.mubr.msk.f32.vlgmr.msra.gmra.mxu0 %vm797_vm3, %v766_v2  ;;  %1645 = vmatmul.mubr.msk.f32.vlgmr.msra.gmra.mxu1 %vm797_vm3, %v1160_v56  ;;  %v2187_v2 = vpop.f32.mrf.mxu1 }
 0x145   :  { %1597 = vmatprep.mubr.msk.f32.mxu0 %vm797_vm3, %v767_v3  ;;  %v265_v63 = vpop.permute.xlu0 %264  ;;  %v2189_v3 = vpop.permute.xlu1 %329 }
 0x148   :  { %1598 = vmatmul.mubr.msk.f32.gmra.mxu0 %vm797_vm3, %v768_v4 }
 0x149   :  { %1600 = vmatprep.mubr.msk.f32.mxu0 %vm797_vm3, %v769_v5  ;;  %v260_v1 = vpop.permute.xlu0 %259  ;;  %v2191_v5 = vpop.f32.mrf.mxu1 }
 0x14a   :  { %v580_v4 = vadd.f32 %v1546_v38, %v260_v1  ;;  %2359 = vst [vmem:[#allocation8_spill] sm:$0xff] %v2191_v5  ;;  %v605_v38 = vadd.f32 %v604_v49, %v285_v50 }
 0x14c   :  { %1601 = vmatmul.mubr.msk.f32.gmra.mxu0 %vm797_vm3, %v770_v6  ;;  %v739_v55 = vmax.f32 %v605_v38, 0.0 }
 0x14d   :  { %1603 = vmatprep.mubr.msk.f32.mxu0 %vm797_vm3, %v771_v7  ;;  %v255_v6 = vpop.permute.xlu0 %254 }
 0x14e   :  { %v575_v7 = vadd.f32 %v574_v39, %v255_v6 }
 0x150   :  { %1604 = vmatmul.mubr.msk.f32.gmra.mxu0 %vm797_vm3, %v772_v8  ;;  %v2193_v8 = vpop.permute.xlu1 %404 }
 0x151   :  { %1606 = vmatprep.mubr.msk.f32.mxu0 %vm797_vm3, %v773_v9  ;;  %v734_v9 = vmax.f32 %v580_v4, 0.0 }
 0x154   :  { %1607 = vmatmul.mubr.msk.f32.gmra.mxu0 %vm797_vm3, %v774_v10  ;;  %v590_v10 = vadd.f32 %v1549_v41, %v270_v60 }
 0x155   :  { %1609 = vmatprep.mubr.msk.f32.mxu0 %vm797_vm3, %v775_v11  ;;  %v2195_v11 = vpop.f32.mrf.mxu1 }
 0x156   :  { %2360 = vst [vmem:[#allocation9_spill] sm:$0xff] %v2195_v11 }
 0x158   :  { %1610 = vmatmul.mubr.msk.f32.gmra.mxu0 %vm797_vm3, %v776_v12 }
 0x159   :  { %1612 = vmatprep.mubr.msk.f32.mxu0 %vm797_vm3, %v777_v13  ;;  %v733_v13 = vmax.f32 %v575_v7, 0.0 }
 0x15c   :  { %1613 = vmatmul.mubr.msk.f32.gmra.mxu0 %vm797_vm3, %v778_v14  ;;  %v585_v14 = vadd.f32 %v584_v43, %v265_v63 }
 0x15d   :  { %1615 = vmatprep.mubr.msk.f32.mxu0 %vm797_vm3, %v779_v15 }
 0x160   :  { %1616 = vmatmul.mubr.msk.f32.gmra.mxu0 %vm797_vm3, %v780_v16 }
 0x161   :  { %1618 = vmatprep.mubr.msk.f32.mxu0 %vm797_vm3, %v781_v17  ;;  %v736_v17 = vmax.f32 %v590_v10, 0.0 }
 0x164   :  { %1619 = vmatmul.mubr.msk.f32.gmra.mxu0 %vm797_vm3, %v782_v18  ;;  %v600_v18 = vadd.f32 %v1552_v44, %v280_v53 }
 0x165   :  { %1621 = vmatprep.mubr.msk.f32.mxu0 %vm797_vm3, %v783_v19  ;;  %v2199_v19 = vpop.f32.mrf.mxu1 }
 0x166   :  { %2362 = vst [vmem:[#allocation11_spill] sm:$0xff] %v2199_v19 }
 0x168   :  { %1622 = vmatmul.mubr.msk.f32.gmra.mxu0 %vm797_vm3, %v784_v20 }
 0x169   :  { %1624 = vmatprep.mubr.msk.f32.mxu0 %vm797_vm3, %v785_v21  ;;  %v2203_v21 = vpop.permute.xlu1 %399 }
 0x16c   :  { %1625 = vmatmul.mubr.msk.f32.gmra.mxu0 %vm797_vm3, %v786_v22 }
 0x16d   :  { %1627 = vmatprep.mubr.msk.f32.mxu0 %vm797_vm3, %v787_v23  ;;  %v735_v23 = vmax.f32 %v585_v14, 0.0  ;;  %v395_v41 = vpop.permute.xlu1 %394 }
 0x170   :  { %1628 = vmatmul.mubr.msk.f32.gmra.mxu0 %vm797_vm3, %v788_v24  ;;  %v595_v24 = vadd.f32 %v594_v46, %v275_v58 }
 0x171   :  { %1630 = vmatprep.mubr.msk.f32.mxu0 %vm797_vm3, %v789_v25  ;;  %v390_v60 = vpop.permute.xlu1 %389 }
 0x174   :  { %1631 = vmatmul.mubr.msk.f32.gmra.mxu0 %vm797_vm3, %v790_v26 }
 0x175   :  { %1633 = vmatprep.mubr.msk.f32.mxu0 %vm797_vm3, %v791_v27  ;;  %v738_v27 = vmax.f32 %v600_v18, 0.0  ;;  %v385_v4 = vpop.permute.xlu1 %384 }
 0x178   :  { %1634 = vmatmul.mubr.msk.f32.gmra.mxu0 %vm797_vm3, %v792_v28  ;;  %v610_v28 = vadd.f32 %v1555_v48, %v290_v47 }
 0x179   :  { %1636 = vmatprep.mubr.msk.f32.mxu0 %vm797_vm3, %v793_v29  ;;  %v2207_v29 = vpop.f32.mrf.mxu1 }
 0x17a   :  { %2365 = vst [vmem:[#allocation14_spill] sm:$0xff] %v2207_v29  ;;  %v740_v44 = vmax.f32 %v610_v28, 0.0 }
 0x17c   :  { %1637 = vmatmul.mubr.msk.f32.gmra.mxu0 %vm797_vm3, %v794_v30 }
 0x17d   :  { %1639 = vmatprep.mubr.msk.f32.mxu0 %vm797_vm3, %v795_v31 }
 0x180   :  { %1640 = vmatmul.mubr.msk.f32.gmra.mxu0 %vm797_vm3, %v796_v32  ;;  %v737_v32 = vmax.f32 %v595_v24, 0.0 }
 0x181   :  { %1306 = vmatprep.mubr.f32.mxu0 %v1156_v52  ;;  %v2213_v52 = vpop.f32.mrf.mxu1 }
 0x183   :  { %v2219_v48 = vpop.f32.mrf.mxu1 }
 0x185   :  { %v2227_v63 = vpop.f32.mrf.mxu1 }
 0x187   :  { %v2233_v7 = vpop.f32.mrf.mxu1 }
 0x204   :  { %v1596_v12 = vpop.f32.mrf.mxu0 }
 0x205   :  { %v2197_v15 = vmul.f32 %v1596_v12, %v734_v9  ;;  %v2239_v12 = vpop.f32.mrf.mxu1 }
 0x206   :  { %v964_v16 = vpop.f32.mrf.mxu0 }
 0x207   :  { %2361 = vst [vmem:[#allocation10_spill] sm:$0xff] %v2197_v15  ;;  %v2201_v20 = vmul.f32 %v964_v16, %v733_v13  ;;  %v2241_v13 = vpop.permute.xlu1 %379 }
 0x208   :  { %v1599_v22 = vpop.f32.mrf.mxu0 }
 0x209   :  { %2363 = vst [vmem:[#allocation12_spill] sm:$0xff] %v2201_v20  ;;  %v2205_v25 = vmul.f32 %v1599_v22, %v736_v17  ;;  %v2243_v17 = vpop.f32.mrf.mxu1 }
 0x20a   :  { %v974_v26 = vpop.f32.mrf.mxu0 }
 0x20b   :  { %2364 = vst [vmem:[#allocation13_spill] sm:$0xff] %v2205_v25  ;;  %v2209_v30 = vmul.f32 %v974_v26, %v735_v23  ;;  %v2247_v22 = vpop.permute.xlu1 %374  ;;  %v1585_v24 = vpop.f32.mrf.mxu1  ;;  %v650_v25 = vadd.f32 %v2185_v0, %v2189_v3  ;;  %v640_v0 = vadd.f32 %v2181_v61, %v2150_v35 }
 0x20c   :  { %v1602_v31 = vpop.f32.mrf.mxu0 }
 0x20d   :  { %2366 = vst [vmem:[#allocation15_spill] sm:$0xff] %v2209_v30  ;;  %v2211_v39 = vmul.f32 %v1602_v31, %v738_v27  ;;  %v704_v28 = vpop.f32.mrf.mxu1  ;;  %v748_v5 = vmax.f32 %v650_v25, 0.0  ;;  %v710_v25 = vadd.f32 %v1585_v24, %v390_v60 }
 0x20e   :  { %v984_v43 = vpop.f32.mrf.mxu0 }
 0x20f   :  { %2367 = vst [vmem:[#allocation16_spill] sm:$0xff] %v2211_v39  ;;  %v2215_v46 = vmul.f32 %v984_v43, %v737_v32  ;;  %v2255_v31 = vpop.permute.xlu1 %369  ;;  %v1588_v43 = vpop.f32.mrf.mxu1 }
 0x210   :  { %v1605_v53 = vpop.f32.mrf.mxu0 }
 0x211   :  { %2368 = vst [vmem:[#allocation17_spill] sm:$0xff] %v2215_v46  ;;  %v2217_v56 = vmul.f32 %v1605_v53, %v740_v44 }
 0x212   :  { %v994_v47 = vpop.f32.mrf.mxu0 }
 0x213   :  { %2369 = vst [vmem:[#allocation18_spill] sm:$0xff] %v2217_v56  ;;  %v2221_v58 = vmul.f32 %v994_v47, %v739_v55  ;;  %v2263_v53 = vpop.permute.xlu1 %364  ;;  %v714_v47 = vpop.f32.mrf.mxu1  ;;  %v720_v56 = vadd.f32 %v1588_v43, %v2203_v21  ;;  %v630_v21 = vadd.f32 %v2177_v57, %v2154_v37  ;;  %v620_v57 = vadd.f32 %v2162_v51, %v2158_v42 }
 0x214   :  { %v2223_v49 = vpop.f32.mrf.mxu0  ;;  %v690_v42 = vadd.f32 %v2227_v63, %v2255_v31 }
 0x215   :  { %2370 = vst [vmem:[#allocation19_spill] sm:$0xff] %v2221_v58 }
 0x216   :  { %v2225_v50 = vpop.f32.mrf.mxu0 }
 0x217   :  { %v2271_v30 = vpop.permute.xlu1 %359 }
 0x218   :  { %v2229_v1 = vpop.f32.mrf.mxu0  ;;  %v680_v63 = vadd.f32 %v2213_v52, %v2271_v30 }
 0x21a   :  { %v2231_v6 = vpop.f32.mrf.mxu0 }
 0x21b   :  { %v2279_v58 = vpop.permute.xlu1 %354 }
 0x21c   :  { %v2235_v9 = vpop.f32.mrf.mxu0 }
 0x21e   :  { %v2237_v10 = vpop.f32.mrf.mxu0 }
 0x21f   :  { %v350_v43 = vpop.permute.xlu1 %349 }
 0x220   :  { %v1617_v14 = vpop.f32.mrf.mxu0 }
 0x222   :  { %v1034_v16 = vpop.f32.mrf.mxu0 }
 0x224   :  { %v2245_v18 = vpop.f32.mrf.mxu0 }
 0x225   :  { %2371 = vst [vmem:[#allocation20_spill] sm:$0xff] %v2245_v18 }
 0x226   :  { %v2249_v23 = vpop.f32.mrf.mxu0 }
 0x227   :  { %2372 = vst [vmem:[#allocation21_spill] sm:$0xff] %v2249_v23  ;;  %v1591_v23 = vpop.f32.mrf.mxu1 }
 0x228   :  { %v2251_v26 = vpop.f32.mrf.mxu0 }
 0x229   :  { %2373 = vst [vmem:[#allocation22_spill] sm:$0xff] %v2251_v26  ;;  %v724_v46 = vpop.f32.mrf.mxu1  ;;  %v730_v26 = vadd.f32 %v1591_v23, %v2146_v33  ;;  %v1138_v23 = vmul.f32 %v1617_v14, %v748_v5 }
 0x22a   :  { %v2253_v27 = vpop.f32.mrf.mxu0  ;;  %v725_v39 = vadd.f32 %v724_v46, %v2193_v8  ;;  %v635_v8 = vadd.f32 %v2183_v62, %v2152_v36  ;;  %v625_v36 = vadd.f32 %v2179_v59, %v2156_v40  ;;  %v695_v40 = vadd.f32 %v2243_v17, %v2247_v22 }
 0x22b   :  { %2374 = vst [vmem:[#allocation23_spill] sm:$0xff] %v2253_v27  ;;  %v764_v29 = vmax.f32 %v730_v26, 0.0  ;;  %v746_v26 = vmax.f32 %v640_v0, 0.0  ;;  %v756_v22 = vmax.f32 %v690_v42, 0.0 }
 0x22c   :  { %v2257_v32 = vpop.f32.mrf.mxu0  ;;  %v763_v19 = vmax.f32 %v725_v39, 0.0  ;;  %v705_v39 = vadd.f32 %v704_v28, %v385_v4  ;;  %v745_v62 = vmax.f32 %v635_v8, 0.0  ;;  %v615_v4 = vadd.f32 %v2167_v54, %v2160_v45 }
 0x22d   :  { %2375 = vst [vmem:[#allocation24_spill] sm:$0xff] %v2257_v32  ;;  %v1136_v5 = vmul.f32 %v2235_v9, %v746_v26  ;;  %v743_v9 = vmax.f32 %v625_v36, 0.0  ;;  %v757_v17 = vmax.f32 %v695_v40, 0.0  ;;  %v1157_v40 = vld [vmem:[%s2354_s5 + $0x10] sm:$0x3] }
 0x22e   :  { %v2259_v38 = vpop.f32.mrf.mxu0  ;;  %v759_v60 = vmax.f32 %v705_v39, 0.0  ;;  %v741_v54 = vmax.f32 %v615_v4, 0.0 }
 0x22f   :  { %2376 = vst [vmem:[#allocation25_spill] sm:$0xff] %v2259_v38  ;;  %v645_v38 = vadd.f32 %v2187_v2, %v2148_v34  ;;  %v762_v2 = vmax.f32 %v720_v56, 0.0  ;;  %v744_v56 = vmax.f32 %v630_v21, 0.0 }
 0x230   :  { %v2261_v44 = vpop.f32.mrf.mxu0  ;;  %v2390_v21 = vld [vmem:[#allocation22_spill] sm:$0xff] }
 0x231   :  { %2377 = vst [vmem:[#allocation26_spill] sm:$0xff] %v2261_v44  ;;  %v747_v46 = vmax.f32 %v645_v38, 0.0 }
 0x232   :  { %v2265_v55 = vpop.f32.mrf.mxu0 }
 0x233   :  { %2378 = vst [vmem:[#allocation27_spill] sm:$0xff] %v2265_v55  ;;  %v715_v55 = vadd.f32 %v714_v47, %v395_v41  ;;  %v1137_v35 = vmul.f32 %v1034_v16, %v747_v46  ;;  %v700_v41 = vadd.f32 %v2239_v12, %v2241_v13  ;;  %v345_v12 = vpop.permute.xlu1 %344  ;;  %v1134_v13 = vmul.f32 %v2229_v1, %v744_v56  ;;  %v1155_v56 = vld [vmem:[%s2354_s5] sm:$0xff] }
 0x234   :  { %v2267_v20 = vpop.f32.mrf.mxu0  ;;  %v1133_v16 = vmul.f32 %v2231_v6, %v743_v9  ;;  %v1131_v6 = vmul.f32 %v2225_v50, %v741_v54  ;;  %v2383_v50 = vld [vmem:[#allocation14_spill] sm:$0xff] }
 0x235   :  { %v761_v61 = vmax.f32 %v715_v55, 0.0  ;;  %v758_v14 = vmax.f32 %v700_v41, 0.0  ;;  %v2384_v55 = vld [vmem:[#allocation24_spill] sm:$0xff]  ;;  %v2396_v41 = vld [vmem:[#allocation21_spill] sm:$0xff] }
 0x236   :  { %v2269_v15 = vpop.f32.mrf.mxu0  ;;  %v2387_v8 = vld [vmem:[#allocation25_spill] sm:$0xff] }
 0x237   :  { %v1148_v45 = vmul.f32 %v2267_v20, %v758_v14  ;;  %v1147_v24 = vmul.f32 %v2269_v15, %v757_v17  ;;  %v675_v20 = vadd.f32 %v2219_v48, %v2279_v58  ;;  %v2382_v15 = vld [vmem:[#allocation18_spill] sm:$0xff]  ;;  %v2385_v48 = vld [vmem:[#allocation19_spill] sm:$0xff] }
 0x238   :  { %v1635_v18 = vpop.f32.mrf.mxu0 }
 0x239   :  { %v753_v52 = vmax.f32 %v675_v20, 0.0 }
 0x23a   :  { %v1094_v27 = vpop.f32.mrf.mxu0 }
 0x23b   :  { %v1149_v51 = vmul.f32 %v1094_v27, %v759_v60  ;;  %v340_v27 = vpop.permute.xlu1 %339  ;;  %v1143_v46 = vmul.f32 %v2387_v8, %v753_v52  ;;  %v2398_v60 = vld [vmem:[#allocation12_spill] sm:$0xff] }
 0x23c   :  { %v1638_v11 = vpop.f32.mrf.mxu0 }
 0x23e   :  { %v1104_v32 = vpop.f32.mrf.mxu0 }
 0x23f   :  { %v1151_v37 = vmul.f32 %v1104_v32, %v761_v61  ;;  %v2380_v32 = vld [vmem:[#allocation11_spill] sm:$0xff]  ;;  %v335_v0 = vpop.permute.xlu1 %334 }
 0x240   :  { %v1641_v3 = vpop.f32.mrf.mxu0  ;;  %v670_v38 = vadd.f32 %v2380_v32, %v350_v43  ;;  %v2391_v43 = vld [vmem:[#allocation17_spill] sm:$0xff]  ;;  %v2392_v61 = vld [vmem:[#allocation23_spill] sm:$0xff] }
 0x241   :  { %v1154_v33 = vmul.f32 %v1641_v3, %v764_v29  ;;  %v1152_v29 = vmul.f32 %v1638_v11, %v762_v2  ;;  %v1135_v11 = vmul.f32 %v2237_v10, %v745_v62  ;;  %v742_v10 = vmax.f32 %v620_v57, 0.0  ;;  %v2386_v3 = vld [vmem:[#allocation8_spill] sm:$0xff]  ;;  %v2389_v2 = vld [vmem:[#allocation9_spill] sm:$0xff]  ;;  %v2397_v57 = vld [vmem:[#allocation10_spill] sm:$0xff] }
 0x242   :  { %v1114_v34 = vpop.f32.mrf.mxu0  ;;  %v752_v58 = vmax.f32 %v670_v38, 0.0  ;;  %v2394_v62 = vld [vmem:[#allocation20_spill] sm:$0xff] }
 0x243   :  { %v1153_v44 = vmul.f32 %v1114_v34, %v763_v19  ;;  %1495 = vmatprep.subr.mxu0 %v1154_v33  ;;  %v760_v19 = vmax.f32 %v710_v25, 0.0  ;;  %v1132_v1 = vmul.f32 %v2223_v49, %v742_v10  ;;  %v754_v49 = vmax.f32 %v680_v63, 0.0 }
 0x244   :  { %1496 = vmatpush3.msra.mxu0 %v1138_v23  ;;  %v660_v33 = vadd.f32 %v2386_v3, %v340_v27  ;;  %v2388_v23 = vld [vmem:[#allocation16_spill] sm:$0xff]  ;;  %v655_v25 = vadd.f32 %v2389_v2, %v335_v0  ;;  %v1142_v26 = vmul.f32 %v2390_v21, %v752_v58 }
 0x245   :  { %1497 = vmatprep.subr.mxu0 %v1153_v44  ;;  %v1150_v59 = vmul.f32 %v1635_v18, %v760_v19  ;;  %v685_v18 = vadd.f32 %v2233_v7, %v2263_v53  ;;  %v2379_v7 = vld [vmem:[#allocation26_spill] sm:$0xff]  ;;  %v2381_v44 = vld [vmem:[#allocation27_spill] sm:$0xff]  ;;  %v665_v53 = vadd.f32 %v2383_v50, %v345_v12  ;;  %v1144_v47 = vmul.f32 %v2384_v55, %v754_v49 }
 0x246   :  { %1498 = vmatpush3.msra.mxu0 %v1137_v35  ;;  %v1146_v31 = vmul.f32 %v2379_v7, %v756_v22  ;;  %v750_v35 = vmax.f32 %v660_v33, 0.0  ;;  %v749_v36 = vmax.f32 %v655_v25, 0.0  ;;  %v2395_v19 = vld [vmem:[#allocation15_spill] sm:$0xff] }
 0x247   :  { %1499 = vmatprep.subr.mxu0 %v1152_v29  ;;  %v755_v28 = vmax.f32 %v685_v18, 0.0  ;;  %v751_v34 = vmax.f32 %v665_v53, 0.0  ;;  %v2393_v29 = vld [vmem:[#allocation13_spill] sm:$0xff] }
 0x248   :  { %1500 = vmatpush3.msra.mxu0 %v1136_v5  ;;  %v1140_v5 = vmul.f32 %v2394_v62, %v750_v35 }
 0x249   :  { %1501 = vmatprep.subr.mxu0 %v1151_v37  ;;  %v1145_v30 = vmul.f32 %v2381_v44, %v755_v28  ;;  %v1141_v39 = vmul.f32 %v2392_v61, %v751_v34  ;;  %v1139_v37 = vmul.f32 %v2396_v41, %v749_v36 }
 0x24a   :  { %1502 = vmatpush3.msra.mxu0 %v1135_v11  ;;  %v1158_v11 = vld [vmem:[%s2354_s5 + $0x18] sm:$0x3] }
 0x24b   :  { %1503 = vmatprep.subr.mxu0 %v1150_v59 }
 0x24c   :  { %1504 = vmatpush3.msra.mxu0 %v1134_v13 }
 0x24d   :  { %1505 = vmatprep.subr.mxu0 %v1149_v51 }
 0x24e   :  { %1506 = vmatpush3.msra.mxu0 %v1133_v16 }
 0x24f   :  { %1507 = vmatprep.subr.mxu0 %v1148_v45 }
 0x250   :  { %1508 = vmatpush3.msra.mxu0 %v1132_v1 }
 0x251   :  { %1509 = vmatprep.subr.mxu0 %v1147_v24 }
 0x252   :  { %1510 = vmatpush3.msra.mxu0 %v1131_v6 }
 0x253   :  { %1511 = vmatprep.subr.mxu0 %v1146_v31 }
 0x254   :  { %1512 = vmatpush3.msra.mxu0 %v2382_v15 }
 0x255   :  { %1513 = vmatprep.subr.mxu0 %v1145_v30 }
 0x256   :  { %1514 = vmatpush3.msra.mxu0 %v2385_v48 }
 0x257   :  { %1515 = vmatprep.subr.mxu0 %v1144_v47 }
 0x258   :  { %1516 = vmatpush3.msra.mxu0 %v2388_v23 }
 0x259   :  { %1517 = vmatprep.subr.mxu0 %v1143_v46 }
 0x25a   :  { %1518 = vmatpush3.msra.mxu0 %v2391_v43 }
 0x25b   :  { %1519 = vmatprep.subr.mxu0 %v1142_v26 }
 0x25c   :  { %1520 = vmatpush3.msra.mxu0 %v2393_v29 }
 0x25d   :  { %1521 = vmatprep.subr.mxu0 %v1141_v39 }
 0x25e   :  { %1522 = vmatpush3.msra.mxu0 %v2395_v19 }
 0x25f   :  { %1523 = vmatprep.subr.mxu0 %v1140_v5 }
 0x260   :  { %1524 = vmatpush3.msra.mxu0 %v2397_v57 }
 0x261   :  { %1525 = vmatprep.subr.mxu0 %v1139_v37 }
 0x262   :  { %1526 = vmatpush3.msra.mxu0 %v2398_v60 }
 0x263   :  { %1307 = vmatmul.mubr.f32.vlgmr.msra.gmra.mxu0 %v1155_v56 }
 0x264   :  { %1311 = vmatprep.mubr.f32.mxu0 %v1158_v11 }
 0x267   :  { %1312 = vmatmul.mubr.f32.gmra.mxu0 %v1157_v40 }
 0x268   :  { %1671 = shalt.err (!%p1668_p4)
}
 0x269   :  { %1342 = dma.vmem_to_hbm [thread:$0]  %s1340_s19, 64, %s2358_s9, [#allocation5]   ;;  %v1646_v59 = vpop.f32.mrf.mxu1  ;;  %vm1317_vm0 = vcmask 130048   ;;  %vm1319_vm1 = vcmask 123904  }
 0x26a   :  { %s1708_s5 = smov [#allocation2]  }
 0x26b   :  { %v1233_v12 = vpop.f32.mrf.mxu1  ;;  %s1326_s21 = sshll.u32 %s1708_s5, 4  ;;  %s1327_s21 = int_to_ptr.vmem [resolvable:$true] %s1326_s21 }
 0x26c   :  { %s1680_s4 = scalar_lea.vmem %s1327_s21, 256  ;;  %p1685_p6 = scmp.lt.s32.totalorder %s1327_s21, %s1327_s21 }
 0x26d   :  { %p1681_p5 = scmp.ne.s32.totalorder %s1327_s21, %s1680_s4  ;;  %p1686_p7 = scmp.lt.s32.totalorder %s1680_s4, %s1680_s4 }
 0x26f   :  { %p1687_p8 = por %p1686_p7, %p1685_p6 }
 0x271   :  { %p1688_p9 = pnand %p1687_p8, %p1681_p5 }
 0x323   :  { %v1527_v4 = vpop.f32.mrf.mxu0 }
 0x325   :  { %v1528_v9 = vpop.f32.mrf.mxu0 }
 0x326   :  { %v1529_v13 = vadd.f32 %v1528_v9, %v1527_v4 }
 0x327   :  { %v1530_v14 = vpop.f32.mrf.mxu0 }
 0x328   :  { %v1309_v42 = vadd.f32 %v1529_v13, %v1233_v12 }
 0x329   :  { %v1531_v51 = vpop.f32.mrf.mxu0 }
 0x32a   :  { %1318 = vst.msk [vmem:[#allocation2] sm:$0xff] %vm1317_vm0, %v1309_v42  ;;  %v1532_v10 = vadd.f32 %v1531_v51, %v1530_v14 }
 0x32c   :  { %v1314_v16 = vadd.f32 %v1646_v59, %v1532_v10 }
 0x32e   :  { %1320 = vst.msk [vmem:[#allocation2 + $0x8] sm:$0x3] %vm1319_vm1, %v1314_v16 }
 0x32f   :  { %1691 = shalt.err (!%p1688_p9)
}
 0x330   :  { %s1709_s9 = smov 128   ;;  %s1710_s22 = smov 8  }
 0x331   :  { %1332 = dma.vmem_to_hbm [thread:$0]  %s1327_s21, 256, %s2357_s8, [#allocation3], %s1709_s9, %s1709_s9, %s1710_s22  }
 0x332   :  { %1700 = dma.done.wait [#allocation3], 256  }
 0x333   :  { %1701 = vsyncadd [#allocation3], 4294967040 }
 0x334   :  { %1702 = dma.done.wait [#allocation5], 64  }
 0x335   :  { %1703 = vsyncadd [#allocation5], 4294967232 }
 0x336   :  { %1349 = vsyncpa [#allocation3], 1 }
 0x337   :  { %1350 = vsyncpa [#allocation5], 1 }

</bundles_post_ra>
